<compile_context>
chip_gen: v7x
topology: tpu7x:2x2x1
jax: 0.10.0
libtpu: 0.0.40
codegen_flags: <defaults>
</compile_context>

<pallas_src>
import numpy as np
import jax
import jax.numpy as jnp
from jax import lax
from jax.experimental import pallas as pl
from jax.experimental.pallas import tpu as pltpu

_NUM_SPLITS = 2                # leading "parallel" grid axis (v7x 2-TC split)
_TARGET_F32_BLOCK = 2 << 20    # ~2 MiB of f32 per input block
_VMEM_LIMIT_BYTES = 32 << 20   # safe on v5e/v6e/v7x, covers the 2 MiB tiles


def _make_kernel(*, bc, hw, w, tile_bc, steps, scale_h, scale_w, masked):
    fold = (tile_bc % 8 == 0)

    def _fold_rows(p):
        # Reduce the leading (image) axis down to 8 sublanes with vreg-wise
        # adds; keeps the accumulators small.  Only used when tile_bc % 8 == 0
        # (otherwise tile_bc == B*C and we accumulate directly).
        if fold:
            return jnp.sum(p.reshape(tile_bc // 8, 8, p.shape[-1]), axis=0)
        return p

    def kernel(x_ref, out_ref, acc_h_ref, acc_w_ref):
        c = pl.program_id(0)          # parallel (core) axis
        i = pl.program_id(1)          # sequential reduction axis

        @pl.when(i == 0)
        def _():
            acc_h_ref[...] = jnp.zeros_like(acc_h_ref)
            acc_w_ref[...] = jnp.zeros_like(acc_w_ref)

        x = x_ref[...].astype(jnp.float32)            # (tile_bc, hw)

        if masked:
            # Zero rows of padded / duplicated tiles (ragged cdiv grid and the
            # 2-way core split).  Use jnp.where (not multiply) so stale VMEM
            # garbage can never poison the sum with NaN/Inf.
            t = c * steps + i                         # global tile index
            valid = bc - t * tile_bc
            rows = lax.broadcasted_iota(jnp.int32, (tile_bc, 1), 0)
            x = jnp.where(rows < valid, x, 0.0)

        # h-difference: every flattened position j < hw - w is a valid pair.
        dh = x[:, w:] - x[:, : hw - w]                # (tile_bc, hw - w)
        # w-difference: positions with j % w == w - 1 are cross-row pairs and
        # are masked out once, in the epilogue.
        dw = x[:, 1:] - x[:, : hw - 1]                # (tile_bc, hw - 1)

        acc_h_ref[...] += _fold_rows(dh * dh)
        acc_w_ref[...] += _fold_rows(dw * dw)

        @pl.when(i == pl.num_programs(1) - 1)
        def _():
            h_tv = jnp.sum(acc_h_ref[...])            # single XLU reduction
            col = lax.broadcasted_iota(jnp.int32, acc_w_ref.shape, 1)
            w_tv = jnp.sum(jnp.where(col % w != w - 1, acc_w_ref[...], 0.0))
            partial = scale_h * h_tv + scale_w * w_tv
            out_ref[...] = jnp.full(out_ref.shape, partial, jnp.float32)

    return kernel


def _pick_tile_bc(bc, hw):
    """Rows per block: as many as fit ~2 MiB of f32; multiple of 8 (or == bc)."""
    budget_rows = max(1, _TARGET_F32_BLOCK // (hw * 4))
    if bc <= budget_rows:
        return bc
    return max(8, (budget_rows // 8) * 8)


def tv_loss(x, weight=1.0):
    B, C, H, W = x.shape
    if H < 2 or W < 2:
        raise ValueError("TVLoss requires H >= 2 and W >= 2")
    bc = B * C
    hw = H * W
    scale_h = 2.0 * float(weight) / (C * (H - 1) * W * B)
    scale_w = 2.0 * float(weight) / (C * H * (W - 1) * B)

    x2 = x.reshape(bc, hw)                    # metadata-only reshape, no cast
    tile_bc = _pick_tile_bc(bc, hw)
    num_tiles = -(-bc // tile_bc)             # cdiv
    steps = -(-num_tiles // _NUM_SPLITS)      # cdiv
    masked = (_NUM_SPLITS * steps * tile_bc != bc)
    acc_rows = 8 if tile_bc % 8 == 0 else tile_bc

    kernel = _make_kernel(bc=bc, hw=hw, w=W, tile_bc=tile_bc, steps=steps,
                          scale_h=scale_h, scale_w=scale_w, masked=masked)

    out = pl.pallas_call(
        kernel,
        out_shape=jax.ShapeDtypeStruct((_NUM_SPLITS, 8, 128), jnp.float32),
        grid_spec=pltpu.PrefetchScalarGridSpec(
            num_scalar_prefetch=0,
            grid=(_NUM_SPLITS, steps),
            in_specs=[pl.BlockSpec(
                (tile_bc, hw),
                # wrap with % so the index is always a valid block; extra
                # (duplicated) tiles are zeroed by the in-kernel row mask.
                lambda c, i: ((c * steps + i) % num_tiles, 0))],
            out_specs=pl.BlockSpec((1, 8, 128), lambda c, i: (c, 0, 0)),
            scratch_shapes=[
                pltpu.VMEM((acc_rows, hw - W), jnp.float32),
                pltpu.VMEM((acc_rows, hw - 1), jnp.float32),
            ],
        ),
        compiler_params=pltpu.CompilerParams(
            dimension_semantics=("parallel", "arbitrary"),
            vmem_limit_bytes=_VMEM_LIMIT_BYTES,
        ),
        cost_estimate=pl.CostEstimate(
            flops=6 * bc * hw,
            transcendentals=0,
            bytes_accessed=int(x.size) * x.dtype.itemsize
                           + _NUM_SPLITS * 8 * 128 * 4,
        ),
    )(x2)
    # Sum the per-core partial losses.
    return jnp.sum(out[:, 0, 0])


if __name__ == "__main__":
    key = jax.random.PRNGKey(0)
    x = jax.random.normal(key, (2, 4, 16, 16), dtype=jnp.float32)

    weight = 1.0
    out = tv_loss(x, weight=weight)
    out = jax.block_until_ready(out)

    # pure-JAX reference (matches the PyTorch forward exactly)
    B, C, H, W = x.shape
    count_h = C * (H - 1) * W
    count_w = C * H * (W - 1)
    h_tv = jnp.sum((x[:, :, 1:, :] - x[:, :, :-1, :]) ** 2)
    w_tv = jnp.sum((x[:, :, :, 1:] - x[:, :, :, :-1]) ** 2)
    ref = weight * 2.0 * (h_tv / count_h + w_tv / count_w) / B

    assert np.allclose(np.asarray(out), np.asarray(ref), rtol=1e-5, atol=1e-6)
    print("KERNEL_OK")
</pallas_src>

<mosaic_0001>
module attributes {stable_mosaic.version = 11 : i64} {
  func.func @kernel(%arg0: i32, %arg1: i32, %arg2: memref<8x256xf32, #tpu.memory_space<vmem>>, %arg3: memref<1x8x128xf32, #tpu.memory_space<vmem>>, %arg4: memref<8x240xf32, #tpu.memory_space<vmem>>, %arg5: memref<8x255xf32, #tpu.memory_space<vmem>>) attributes {dimension_semantics = [#tpu.dimension_semantics<parallel>, #tpu.dimension_semantics<arbitrary>], iteration_bounds = array<i64: 2, 1>, scalar_prefetch = 0 : i64, scratch_operands = 2 : i64, tpu.core_type = #tpu.core_type<tc>, window_params = [{transform_indices = @transform_0, window_bounds = array<i64: 8, 256>}, {transform_indices = @transform_1, window_bounds = array<i64: 1, 8, 128>}]} {
    %c0_i32 = arith.constant 0 : i32
    %0 = arith.cmpi eq, %arg1, %c0_i32 : i32
    %1 = arith.extui %0 : i1 to i32
    %c0_i32_0 = arith.constant 0 : i32
    %2 = arith.cmpi ne, %1, %c0_i32_0 : i32
    scf.if %2 {
      %cst_15 = arith.constant 0.000000e+00 : f32
      %36 = vector.broadcast %cst_15 : f32 to vector<8x240xf32>
      %c0_16 = arith.constant 0 : index
      %c0_17 = arith.constant 0 : index
      %37 = vector.load %arg4[%c0_16, %c0_17] : memref<8x240xf32, #tpu.memory_space<vmem>>, vector<8x240xf32>
      tpu.vector_store %arg4[%c0_16, %c0_17], %36 {strides = array<i32>} : memref<8x240xf32, #tpu.memory_space<vmem>>, vector<8x240xf32>,
      %cst_18 = arith.constant 0.000000e+00 : f32
      %38 = vector.broadcast %cst_18 : f32 to vector<8x255xf32>
      %c0_19 = arith.constant 0 : index
      %c0_20 = arith.constant 0 : index
      %39 = vector.load %arg5[%c0_19, %c0_20] : memref<8x255xf32, #tpu.memory_space<vmem>>, vector<8x255xf32>
      tpu.vector_store %arg5[%c0_19, %c0_20], %38 {strides = array<i32>} : memref<8x255xf32, #tpu.memory_space<vmem>>, vector<8x255xf32>,
    } else {
    }
    %c0 = arith.constant 0 : index
    %c0_1 = arith.constant 0 : index
    %3 = vector.load %arg2[%c0, %c0_1] : memref<8x256xf32, #tpu.memory_space<vmem>>, vector<8x256xf32>
    %c1_i32 = arith.constant 1 : i32
    %4 = arith.muli %arg0, %c1_i32 : i32
    %5 = arith.addi %4, %arg1 : i32
    %c8_i32 = arith.constant 8 : i32
    %6 = arith.muli %5, %c8_i32 : i32
    %c8_i32_2 = arith.constant 8 : i32
    %7 = arith.subi %c8_i32_2, %6 : i32
    %8 = tpu.iota {dimensions = array<i32: 0>} : vector<8x1xi32>
    %9 = vector.broadcast %7 : i32 to vector<8x1xi32>
    %10 = arith.cmpi slt, %8, %9 : vector<8x1xi32>
    %cst = arith.constant 0.000000e+00 : f32
    %11 = vector.shape_cast %10 : vector<8x1xi1> to vector<8x1xi1>
    %12 = vector.broadcast %11 : vector<8x1xi1> to vector<8x256xi1>
    %13 = vector.broadcast %cst : f32 to vector<8x256xf32>
    %14 = arith.select %12, %3, %13 : vector<8x256xi1>, vector<8x256xf32>
    %15 = vector.extract_strided_slice %14 {offsets = [0, 16], sizes = [8, 240], strides = [1, 1]} : vector<8x256xf32> to vector<8x240xf32>
    %16 = vector.extract_strided_slice %14 {offsets = [0, 0], sizes = [8, 240], strides = [1, 1]} : vector<8x256xf32> to vector<8x240xf32>
    %17 = arith.subf %15, %16 : vector<8x240xf32>
    %18 = vector.extract_strided_slice %14 {offsets = [0, 1], sizes = [8, 255], strides = [1, 1]} : vector<8x256xf32> to vector<8x255xf32>
    %19 = vector.extract_strided_slice %14 {offsets = [0, 0], sizes = [8, 255], strides = [1, 1]} : vector<8x256xf32> to vector<8x255xf32>
    %20 = arith.subf %18, %19 : vector<8x255xf32>
    %c0_3 = arith.constant 0 : index
    %c0_4 = arith.constant 0 : index
    %21 = vector.load %arg4[%c0_3, %c0_4] : memref<8x240xf32, #tpu.memory_space<vmem>>, vector<8x240xf32>
    %22 = arith.mulf %17, %17 : vector<8x240xf32>
    %23 = vector.shape_cast %22 : vector<8x240xf32> to vector<1x8x240xf32>
    %cst_5 = arith.constant dense<0.000000e+00> : vector<8x240xf32>
    %24 = vector.multi_reduction <add>, %23, %cst_5 [0] : vector<1x8x240xf32> to vector<8x240xf32>
    %25 = arith.addf %21, %24 : vector<8x240xf32>
    %c0_6 = arith.constant 0 : index
    %c0_7 = arith.constant 0 : index
    %26 = vector.load %arg4[%c0_6, %c0_7] : memref<8x240xf32, #tpu.memory_space<vmem>>, vector<8x240xf32>
    tpu.vector_store %arg4[%c0_6, %c0_7], %25 {strides = array<i32>} : memref<8x240xf32, #tpu.memory_space<vmem>>, vector<8x240xf32>,
    %c0_8 = arith.constant 0 : index
    %c0_9 = arith.constant 0 : index
    %27 = vector.load %arg5[%c0_8, %c0_9] : memref<8x255xf32, #tpu.memory_space<vmem>>, vector<8x255xf32>
    %28 = arith.mulf %20, %20 : vector<8x255xf32>
    %29 = vector.shape_cast %28 : vector<8x255xf32> to vector<1x8x255xf32>
    %cst_10 = arith.constant dense<0.000000e+00> : vector<8x255xf32>
    %30 = vector.multi_reduction <add>, %29, %cst_10 [0] : vector<1x8x255xf32> to vector<8x255xf32>
    %31 = arith.addf %27, %30 : vector<8x255xf32>
    %c0_11 = arith.constant 0 : index
    %c0_12 = arith.constant 0 : index
    %32 = vector.load %arg5[%c0_11, %c0_12] : memref<8x255xf32, #tpu.memory_space<vmem>>, vector<8x255xf32>
    tpu.vector_store %arg5[%c0_11, %c0_12], %31 {strides = array<i32>} : memref<8x255xf32, #tpu.memory_space<vmem>>, vector<8x255xf32>,
    %c0_i32_13 = arith.constant 0 : i32
    %33 = arith.cmpi eq, %arg1, %c0_i32_13 : i32
    %34 = arith.extui %33 : i1 to i32
    %c0_i32_14 = arith.constant 0 : i32
    %35 = arith.cmpi ne, %34, %c0_i32_14 : i32
    scf.if %35 {
      %c0_15 = arith.constant 0 : index
      %c0_16 = arith.constant 0 : index
      %36 = vector.load %arg4[%c0_15, %c0_16] : memref<8x240xf32, #tpu.memory_space<vmem>>, vector<8x240xf32>
      %37 = vector.shape_cast %36 : vector<8x240xf32> to vector<1x8x240xf32>
      %cst_17 = arith.constant dense<0.000000e+00> : vector<1xf32>
      %38 = vector.multi_reduction <add>, %37, %cst_17 [1, 2] : vector<1x8x240xf32> to vector<1xf32>
      %39 = vector.shape_cast %38 : vector<1xf32> to vector<1x1x1xf32>
      %40 = vector.extract %39[0, 0, 0] : f32 from vector<1x1x1xf32>
      %41 = tpu.iota {dimensions = array<i32: 1>} : vector<8x255xi32>
      %c16_i32 = arith.constant 16 : i32
      %c0_i32_18 = arith.constant 0 : i32
      %42 = arith.cmpi eq, %c16_i32, %c0_i32_18 : i32
      %c1_i32_19 = arith.constant 1 : i32
      %43 = arith.select %42, %c1_i32_19, %c16_i32 : i32
      %44 = vector.broadcast %43 : i32 to vector<8x255xi32>
      %45 = arith.remsi %41, %44 : vector<8x255xi32>
      %c0_i32_20 = arith.constant 0 : i32
      %46 = vector.broadcast %c0_i32_20 : i32 to vector<8x255xi32>
      %47 = arith.cmpi ne, %45, %46 : vector<8x255xi32>
      %c0_i32_21 = arith.constant 0 : i32
      %48 = vector.broadcast %c0_i32_21 : i32 to vector<8x255xi32>
      %49 = arith.cmpi slt, %45, %48 : vector<8x255xi32>
      %c0_i32_22 = arith.constant 0 : i32
      %50 = arith.cmpi slt, %43, %c0_i32_22 : i32
      %51 = vector.broadcast %50 : i1 to vector<8x255xi1>
      %52 = vector.broadcast %51 : vector<8x255xi1> to vector<8x255xi1>
      %53 = arith.xori %49, %52 : vector<8x255xi1>
      %54 = arith.andi %53, %47 : vector<8x255xi1>
      %55 = vector.broadcast %43 : i32 to vector<8x255xi32>
      %56 = arith.addi %45, %55 : vector<8x255xi32>
      %57 = arith.select %54, %56, %45 : vector<8x255xi1>, vector<8x255xi32>
      %c15_i32 = arith.constant 15 : i32
      %58 = vector.broadcast %c15_i32 : i32 to vector<8x255xi32>
      %59 = arith.cmpi ne, %57, %58 : vector<8x255xi32>
      %c0_23 = arith.constant 0 : index
      %c0_24 = arith.constant 0 : index
      %60 = vector.load %arg5[%c0_23, %c0_24] : memref<8x255xf32, #tpu.memory_space<vmem>>, vector<8x255xf32>
      %cst_25 = arith.constant 0.000000e+00 : f32
      %61 = vector.broadcast %cst_25 : f32 to vector<8x255xf32>
      %62 = arith.select %59, %60, %61 : vector<8x255xi1>, vector<8x255xf32>
      %63 = vector.shape_cast %62 : vector<8x255xf32> to vector<1x8x255xf32>
      %cst_26 = arith.constant dense<0.000000e+00> : vector<1xf32>
      %64 = vector.multi_reduction <add>, %63, %cst_26 [1, 2] : vector<1x8x255xf32> to vector<1xf32>
      %65 = vector.shape_cast %64 : vector<1xf32> to vector<1x1x1xf32>
      %66 = vector.extract %65[0, 0, 0] : f32 from vector<1x1x1xf32>
      %cst_27 = arith.constant 0.00104166672 : f32
      %67 = arith.mulf %cst_27, %40 : f32
      %cst_28 = arith.constant 0.00104166672 : f32
      %68 = arith.mulf %cst_28, %66 : f32
      %69 = arith.addf %67, %68 : f32
      %70 = vector.broadcast %69 : f32 to vector<1x8x128xf32>
      %c0_29 = arith.constant 0 : index
      %c0_30 = arith.constant 0 : index
      %c0_31 = arith.constant 0 : index
      %71 = vector.load %arg3[%c0_29, %c0_30, %c0_31] : memref<1x8x128xf32, #tpu.memory_space<vmem>>, vector<1x8x128xf32>
      tpu.vector_store %arg3[%c0_29, %c0_30, %c0_31], %70 {strides = array<i32>} : memref<1x8x128xf32, #tpu.memory_space<vmem>>, vector<1x8x128xf32>,
    } else {
    }
    return
  }
  func.func @transform_0(%arg0: i32, %arg1: i32) -> (i32, i32) {
    %c1_i32 = arith.constant 1 : i32
    %0 = arith.muli %arg0, %c1_i32 : i32
    %1 = arith.addi %0, %arg1 : i32
    %c1_i32_0 = arith.constant 1 : i32
    %c0_i32 = arith.constant 0 : i32
    %2 = arith.cmpi eq, %c1_i32_0, %c0_i32 : i32
    %c1_i32_1 = arith.constant 1 : i32
    %3 = arith.select %2, %c1_i32_1, %c1_i32_0 : i32
    %4 = arith.remsi %1, %3 : i32
    %c0_i32_2 = arith.constant 0 : i32
    %5 = arith.cmpi ne, %4, %c0_i32_2 : i32
    %c0_i32_3 = arith.constant 0 : i32
    %6 = arith.cmpi slt, %4, %c0_i32_3 : i32
    %c0_i32_4 = arith.constant 0 : i32
    %7 = arith.cmpi slt, %3, %c0_i32_4 : i32
    %8 = arith.xori %6, %7 : i1
    %9 = arith.andi %8, %5 : i1
    %10 = arith.addi %4, %3 : i32
    %11 = arith.select %9, %10, %4 : i32
    %c0_i32_5 = arith.constant 0 : i32
    %c0_i32_6 = arith.constant 0 : i32
    return %11, %c0_i32_5 : i32, i32
  }
  func.func @transform_1(%arg0: i32, %arg1: i32) -> (i32, i32, i32) {
    %c0_i32 = arith.constant 0 : i32
    %c0_i32_0 = arith.constant 0 : i32
    %c0_i32_1 = arith.constant 0 : i32
    return %arg0, %c0_i32, %c0_i32_0 : i32, i32, i32
  }
}

</mosaic_0001>

<bundles_post_ra>
// kernel: tpu_custom_call.1
= control target key start
LH: loop header
LB: loop body
LE: loop exit
PB: predicated region body
PF: predicated region fallthrough
CT: control target
= control target key end

     0   :  { %6 = vsyncpa [#allocation5], 0  ;;  %s721_s0 = inlined_call_operand.hbm [shape: f32[8,256], index: 0, kind: input, shape index: {}]   ;;  %s722_s1 = inlined_call_operand.hbm [shape: f32[2,8,128], index: 1, kind: output, shape index: {}]  }
   0x1   :  { %7 = vsyncpa [#allocation6], 0 }
   0x2   :  { %9 = vsyncpa [#allocation6 + $0x1], 0  ;;  %s567_s6 = smov 0   ;;  %s569_s7 = smov 0  }
   0x3   :  { %s571_s8 = smov 0   ;;  %s573_s9 = smov 0  }
   0x4   :  { %s575_s10 = smov 0   ;;  %s577_s11 = smov 0  }
   0x5 LB: > { %s351_s12 = sadd.s32 4294967295, %s548_s11   ;;  %s352_s13 = sadd.s32 4294967294, %s548_s11   ;;  %s548_s11 = sphi %s577_s11, %s15_s11   ;;  %s544_s10 = sphi %s575_s10, %s740_s10   ;;  %s540_s9 = sphi %s573_s9, %s739_s9   ;;  %s536_s8 = sphi %s571_s8, %s738_s8   ;;  %s532_s7 = sphi %s569_s7, %s737_s7   ;;  %s528_s6 = sphi %s567_s6, %s736_s6  }
   0x6   : > { %s27_s14 = sadd.s32 1, %s544_s10  ;;  %s55_s15 = sadd.s32 1, %s536_s8 }
   0x7   : > { %p29_p0 = scmp.ge.s32.totalorder %s27_s14, 2  ;;  %p65_p1 = scmp.ne.s32.totalorder %s536_s8, %s532_s7 }
   0x8   : > { %p66_p2 = scmp.eq.s32.totalorder %s351_s12, 1  ;;  %p71_p3 = scmp.ne.s32.totalorder %s532_s7, %s528_s6 }
   0x9   : > { %s742_s14 = smov (%p29_p0, %s27_s14), 0  ;;  %p72_p5 = scmp.eq.s32.totalorder %s352_s13, 1 }
   0xa   : > { %p607_p4 = por %p66_p2, %p65_p1  ;;  %s52_s17 = ssub.s32 %s544_s10, %s742_s14 }
   0xb   : > { %p353_p6 = scmp.ge.s32.totalorder %s548_s11, 1  ;;  %p53_p7 = scmp.eq.s32.totalorder %s52_s17, 0 }
   0xc   : > { %s727_s16 = scalar_select %p607_p4, 1, 0 }
   0xd   : > { %p614_p8 = por %p72_p5, %p71_p3  ;;  %p79_p9 = scmp.lt.s32.totalorder %s548_s11, 3 }
   0xe   : > { %s620_s19 = scalar_select %p53_p7, %s536_s8, %s55_s15  }
   0xf   : > { %s728_s18 = scalar_select %p614_p8, 1, 0 }
  0x10   : > { %p622_p10 = pnand %p353_p6, %p79_p9  ;;  %p626_p11 = scmp.eq.s32.totalorder %s351_s12, 0 }
  0x11   : > { %s550_s22 = smov [#allocation4]   ;;  %s438_s27 = scalar_lea.hbm %s721_s0, 256 }
  0x12   : > { %s729_s20 = scalar_select %p622_p10, 1, 0 }
  0x13   : > { %s730_s21 = scalar_select %p626_p11, 1, 0 }
  0x14   : > { %p373_p12 = pneg %p622_p10  ;;  %s92_s23 = sshll.u32 %s550_s22, 4  ;;  %s93_s23 = int_to_ptr.vmem [resolvable:$true] %s92_s23 }
  0x15   : > { %p439_p0 = scmp.ne.s32.totalorder %s721_s0, %s438_s27  ;;  %p445_p5 = scmp.lt.u32.totalorder %s438_s27, %s721_s0 }
  0x16   : > { %p634_p13 = pnand %p626_p11, %p373_p12 }
  0x18   : > { %p440_p1 = pneg %p634_p13 }
  0x1a   : > { %p441_p2 = pnand %p440_p1, %p439_p0 }
  0x1c   : > { %p442_p3 = pneg %p441_p2 }
  0x1e   : > { %p447_p6 = pnand %p445_p5, %p442_p3 }
  0x20   : > { %450 = shalt.err (!%p447_p6)
}
  0x21   : > { %s451_s3 = scalar_lea.vmem %s93_s23, 256  ;;  %p459_p8 = scmp.lt.s32.totalorder %s93_s23, %s93_s23 }
  0x22   : > { %p452_p7 = scmp.ne.s32.totalorder %s93_s23, %s451_s3  ;;  %p460_p4 = scmp.lt.s32.totalorder %s451_s3, %s451_s3 }
  0x24   : > { %p454_p9 = pnand %p452_p7, %p440_p1  ;;  %p461_p11 = por %p460_p4, %p459_p8 }
  0x26   : > { %p455_p12 = pneg %p454_p9 }
  0x28   : > { %p462_p10 = pnand %p461_p11, %p455_p12 }
  0x2a   : > { %465 = shalt.err (!%p462_p10)
}
  0x2b   : > { %376 = dma.hbm_to_vmem [thread:$0]  (!%p634_p13), %s721_s0, 256, %s93_s23, [#allocation5]  }
  0x2c   : > { %p732_p0 = scmp.ne.s32.totalorder %s729_s20, 0 }
  0x2d   : > { %p733_p2 = scmp.ne.s32.totalorder (!%p732_p0), %s730_s21, 0 }
  0x2e   : > { %105 = sbr.rel (%p732_p0) target bundleno = 540 (0x21c), region = 24 }
  0x35   : > { %519 = dma.done.wait (%p733_p2), [#allocation5], 256  }
  0x36   : > { %521 = vsyncadd (%p733_p2), [#allocation5], 4294967040  ;;  %s358_s12 = sshll.u32 %s540_s9, 3  ;;  %v135_v0 = vlaneseq  ;;  %v130_v3 = vld [vmem:[#allocation4] sm:$0xff]  ;;  %v131_v4 = vld [vmem:[#allocation4 + $0x8] sm:$0xff]  ;;  %s551_s15 = smov 16  }
  0x37   : > { %s134_s13 = ssub.s32 8, %s358_s12  ;;  %s552_s17 = smov 1   ;;  %vm128_vm1 = vcmask 1039360   ;;  %v553_v7 = vmov 0.0   ;;  %vm125_vm2 = vcmask 916480   ;;  %vm149_vm3 = vcmask 130048  }
  0x38   : > { %v136_v1 = vshrl.u32 %v135_v0, 7  ;;  %v137_v2 = vstv %s134_s13  ;;  %129 = vst.msk [vmem:[#allocation3 + $0x8] sm:$0xff] %vm128_vm1, %v553_v7  ;;  %vm159_vm4 = vcmask 7168   ;;  %s554_s20 = smov 127   ;;  %s555_s21 = smov 112   ;;  %v222_v24 = vand.u32 127, %v135_v0 }
  0x39   : > { %126 = vst.msk [vmem:[#allocation2 + $0x8] sm:$0xff] %vm125_vm2, %v553_v7  ;;  %s117_s22 = sand.u32 1, %s532_s7   ;;  %s360_s25 = sshll.u32 %s540_s9, 7 }
  0x3a   : > { %vm138_vm0 = vcmp.lt.s32.totalorder %v136_v1, %v137_v2  ;;  %v223_v26 = vadd.s32 128, %v222_v24  ;;  %v228_v35 = vand.u32 15, %v222_v24  ;;  %s357_s23 = sshll.u32 %s117_s22, 3  ;;  %s674_s5 = scalar_lea.hbm %s722_s1, %s360_s25 }
  0x3b   : > { %v141_v5 = vsel %vm138_vm0, %v130_v3, 0.0  ;;  %v142_v6 = vsel %vm138_vm0, %v131_v4, 0.0  ;;  %s119_s29 = scalar_lea.vmem [#allocation7], %s357_s23  ;;  %s271_s12 = scalar_lea.sflag [#allocation6], %s117_s22 }
  0x3c   : > { %145 = vrot.lane.b32.xlu1 %v141_v5, %s551_s15  ;;  %155 = vrot.lane.b32.xlu0 %v141_v5, %s552_s17  ;;  %v235_v32 = vand.u32 15, %v223_v26  ;;  %vm248_vm6 = vcmp.ne.s32.totalorder %v228_v35, 15  ;;  %s284_s30 = sshll.u32 %s119_s29, 4  ;;  %p734_p8 = scmp.ne.s32.totalorder %s727_s16, 0  ;;  %s676_s30 = int_to_ptr.vmem [resolvable:$true] %s284_s30 }
  0x3d   : > { %s466_s9 = scalar_lea.vmem %s676_s30, 128  ;;  %s556_s13 = smov [#allocation7]  }
  0x3e   : > { %vm249_vm5 = vcmp.ne.s32.totalorder %v235_v32, 15  ;;  %p467_p4 = scmp.ne.s32.totalorder %s676_s30, %s466_s9 }
  0x3f   : > { %v186_v23 = vld [vmem:[#allocation3 + $0x8] sm:$0xff] }
  0x40   : > { %147 = vrot.lane.b32.xlu1 %v142_v6, %s551_s15  ;;  %157 = vrot.lane.b32.xlu0 %v142_v6, %s552_s17  ;;  %v166_v29 = vld [vmem:[#allocation2 + $0x8] sm:$0xff]  ;;  %p468_p10 = pnand %p467_p4, %p734_p8  ;;  %s470_s15 = sshll.u32 %s556_s13, 4  ;;  %s471_s15 = int_to_ptr.vmem [resolvable:$false] %s470_s15 }
  0x41   : > { %s472_s17 = scalar_lea.vmem %s471_s15, 256  ;;  %p473_p13 = scmp.lt.s32.totalorder %s676_s30, %s471_s15 }
  0x42   : > { %p469_p11 = pneg %p468_p10  ;;  %p474_p1 = scmp.lt.s32.totalorder %s472_s17, %s466_s9 }
  0x44   : > { %p475_p3 = por %p474_p1, %p473_p13 }
  0x46   : > { %p476_p5 = pnand %p475_p3, %p469_p11 }
  0xae   : > { %v146_v8 = vpop.permute.xlu1 %145  ;;  %v156_v9 = vpop.permute.xlu0 %155 }
  0xaf   : > { %v153_v10 = vsub.f32 %v141_v5, %v146_v8  ;;  %v163_v11 = vsub.f32 %v141_v5, %v156_v9 }
  0xb1   : > { %v187_v12 = vmul.f32 %v163_v11, %v163_v11  ;;  %v167_v15 = vmul.f32 %v153_v10, %v153_v10 }
  0xb2   : > { %v148_v13 = vpop.permute.xlu1 %147  ;;  %v158_v14 = vpop.permute.xlu0 %157 }
  0xb3   : > { %v150_v16 = vsel %vm149_vm3, %v146_v8, %v148_v13  ;;  %v160_v17 = vsel %vm159_vm4, %v156_v9, %v158_v14  ;;  %193 = vrot.lane.b32.xlu0 %v187_v12, %s554_s20 }
  0xb4   : > { %v164_v18 = vsub.f32 %v142_v6, %v160_v17  ;;  %v154_v19 = vsub.f32 %v142_v6, %v150_v16 }
  0xb6   : > { %v188_v20 = vmul.f32 %v164_v18, %v164_v18  ;;  %v168_v21 = vmul.f32 %v154_v19, %v154_v19 }
  0xb7   : > { %173 = vrot.lane.b32.xlu0 %v167_v15, %s555_s21 }
  0xb8   : > { %195 = vrot.lane.b32.xlu1 %v188_v20, %s554_s20 }
  0xbc   : > { %175 = vrot.lane.b32.xlu1 %v168_v21, %s555_s21 }
 0x125   : > { %v194_v22 = vpop.permute.xlu0 %193 }
 0x129   : > { %v174_v30 = vpop.permute.xlu0 %173 }
 0x12a   : > { %v196_v25 = vpop.permute.xlu1 %195 }
 0x12b   : > { %v198_v27 = vsel %vm128_vm1, %v194_v22, %v196_v25  ;;  %v202_v28 = vadd.f32 %v196_v25, %v186_v23 }
 0x12c   : > { %v252_v38 = vsel %vm248_vm6, %v198_v27, 0.0 }
 0x12d   : > { %204 = vst.msk [vmem:[#allocation3 + $0x8] sm:$0xff] %vm128_vm1, %v202_v28 }
 0x12e   : > { %v176_v31 = vpop.permute.xlu1 %175 }
 0x12f   : > { %v178_v33 = vsel %vm125_vm2, %v174_v30, %v176_v31  ;;  %v182_v34 = vadd.f32 %v176_v31, %v166_v29 }
 0x131   : > { %184 = vst.msk [vmem:[#allocation2 + $0x8] sm:$0xff] %vm125_vm2, %v182_v34 }
 0x134   : > { %v251_v36 = vld [vmem:[#allocation3 + $0x8] sm:$0xff] }
 0x135   : > { %v253_v37 = vsel %vm249_vm5, %v251_v36, 0.0 }
 0x136   : > { %v254_v39 = vsel %vm128_vm1, %v253_v37, 0.0 }
 0x137   : > { %v255_v40 = vadd.f32 %v254_v39, %v252_v38 }
 0x138   : > { %v209_v41 = vld [vmem:[#allocation2 + $0x8] sm:$0xff] }
 0x139   : > { %256 = vadd.xlane.f32.xlu1 %v255_v40  ;;  %v210_v42 = vsel %vm125_vm2, %v209_v41, 0.0 }
 0x13a   : > { %v211_v43 = vadd.f32 %v210_v42, %v178_v33 }
 0x13c   : > { %212 = vadd.xlane.f32.xlu0 %v211_v43 }
 0x1c6   : > { %v257_v44 = vpop.xlane.xlu1 %256 }
 0x1c7   : > { %v258_v45 = vrot.slane %v257_v44, 4 }
 0x1c9   : > { %v259_v46 = vadd.f32 %v258_v45, %v257_v44  ;;  %v213_v47 = vpop.xlane.xlu0 %212 }
 0x1ca   : > { %v214_v48 = vrot.slane %v213_v47, 4 }
 0x1cb   : > { %v260_v49 = vrot.slane %v259_v46, 2 }
 0x1cc   : > { %v215_v50 = vadd.f32 %v214_v48, %v213_v47 }
 0x1cd   : > { %v261_v51 = vadd.f32 %v260_v49, %v259_v46 }
 0x1ce   : > { %v216_v52 = vrot.slane %v215_v50, 2 }
 0x1cf   : > { %v262_v54 = vrot.slane %v261_v51, 1 }
 0x1d0   : > { %v217_v53 = vadd.f32 %v216_v52, %v215_v50 }
 0x1d1   : > { %v263_v57 = vadd.f32 %v262_v54, %v261_v51 }
 0x1d2   : > { %v218_v55 = vrot.slane %v217_v53, 1 }
 0x1d4   : > { %v219_v56 = vadd.f32 %v218_v55, %v217_v53 }
 0x1d6   : > { %363 = vpush %v219_v56 }
 0x1d7   : > { %365 = vpush %v263_v57 }
 0x207   : > { %s364_s24 = spop %363 }
 0x208   : > { %s265_s26 = smul.f32 0.0010416667, %s364_s24  ;;  %s366_s27 = spop %365 }
 0x209   : > { %s266_s28 = smul.f32 0.0010416667, %s366_s27 }
 0x20b   : > { %s267_s2 = sadd.f32 %s266_s28, %s265_s26 }
 0x20d   : > { %v268_v58 = vstv %s267_s2 }
 0x20e   : > { %269 = vst [vmem:[%s119_s29] sm:$0xff] %v268_v58 }
 0x20f   : > { %479 = shalt.err (!%p476_p5)
}
 0x210   : > { %s480_s20 = scalar_lea.hbm %s674_s5, 128  ;;  %s484_s23 = scalar_lea.hbm %s722_s1, 256 }
 0x211   : > { %p481_p6 = scmp.ne.s32.totalorder %s674_s5, %s480_s20  ;;  %p485_p12 = scmp.lt.u32.totalorder %s674_s5, %s722_s1 }
 0x212   : > { %p486_p0 = scmp.lt.u32.totalorder %s484_s23, %s480_s20  ;;  %p488_p4 = scmp.lt.u32.totalorder %s480_s20, %s674_s5 }
 0x213   : > { %p482_p7 = pnand %p481_p6, %p734_p8 }
 0x214   : > { %p487_p2 = por %p486_p0, %p485_p12 }
 0x215   : > { %p483_p9 = pneg %p482_p7 }
 0x216   : > { %p489_p10 = por %p488_p4, %p487_p2 }
 0x218   : > { %p490_p11 = pnand %p489_p10, %p483_p9 }
 0x21a   : > { %493 = shalt.err (!%p490_p11)
}
 0x21b   : > { %371 = dma.vmem_to_hbm [thread:$0]  (%p734_p8), %s676_s30, 128, %s674_s5, %s271_s12  }
 0x21c PF: > { %p383_p13 = scmp.ge.s32.totalorder %s548_s11, 2  ;;  %s296_s26 = sand.u32 1, %s528_s6  }
 0x21d   : > { %p735_p1 = scmp.ne.s32.totalorder %s728_s18, 0  ;;  %s297_s27 = scalar_lea.sflag [#allocation6], %s296_s26 }
 0x21f   : > { %p378_p3 = pnand %p383_p13, %p735_p1 }
 0x221   : > { %523 = dma.done.wait (!%p378_p3), %s297_s27, 128  }
 0x222   : > { %525 = vsyncadd (!%p378_p3), %s297_s27, 4294967168  ;;  %s15_s11 = sadd.s32 1, %s548_s11   ;;  %s736_s6 = smov %s532_s7 }
 0x223   : > { %p12_p5 = scmp.ge.s32.totalorder %s15_s11, 4   ;;  %s737_s7 = smov %s536_s8 }
 0x224   : > { %s738_s8 = smov %s620_s19  ;;  %s739_s9 = smov %s544_s10 }
 0x225   : > { %s740_s10 = smov %s742_s14  ;;  %14 = sbr.rel (!%p12_p5) target bundleno = 5 (0x5), region = 69 }
 0x22c   :  { %302 = vsyncpa [#allocation5], 1 }
 0x22d   :  { %304 = vsyncpa [#allocation5 + $0x1], 1 }
 0x22e   :  { %305 = vsyncpa [#allocation6], 1 }
 0x22f   :  { %307 = vsyncpa [#allocation6 + $0x1], 1 }

</bundles_post_ra>
